<compile_context>
chip_gen: v5e
topology: v5e:2x2
jax: 0.10.0
libtpu: 0.0.40
codegen_flags: <defaults>
</compile_context>

<pallas_src>
import jax
import jax.numpy as jnp
from jax import lax
from jax.experimental import pallas as pl
from jax.experimental.pallas import tpu as pltpu

EPS = 1e-5  # PyTorch BatchNorm1d default eps


def _residual1d2_kernel(x_ref, w1_ref, w2_ref, w3_ref, w4_ref, b4_ref,
                        g1_ref, t1_ref, g2_ref, t2_ref, g3_ref, t3_ref,
                        out_ref):
    f32 = jnp.float32
    N, _, L = x_ref.shape
    inv_cnt = 1.0 / float(N * L)

    def mm(w, a):  # (Co, Ci) @ (Ci, L) -> (Co, L); f32 accumulation on the MXU
        return jnp.dot(w, a, preferred_element_type=f32)

    def bn_coeffs(ys, g, t):
        # training-mode BatchNorm over (batch, position); two-pass variance.
        # Returns (a, b) with y_bn = y * a + b, a/b of shape (C, 1).
        mu = sum(jnp.sum(y, axis=1, keepdims=True) for y in ys) * inv_cnt
        var = sum(jnp.sum((y - mu) * (y - mu), axis=1, keepdims=True)
                  for y in ys) * inv_cnt
        a = g * lax.rsqrt(var + EPS)
        return a, t - mu * a

    def taps(y):
        # zero-padded +-1 position (lane-axis) shifts for the k=3 conv.
        z = jnp.zeros((y.shape[0], 1), y.dtype)
        ypad = jnp.concatenate([z, y, z], axis=1)          # (Cmid, L+2)
        return ypad[:, 0:L], y, ypad[:, 2:L + 2]           # y[l-1], y[l], y[l+1]

    # Per-batch (C, L) slabs: channels on sublanes, positions on lanes — the
    # natural layout of the trailing dims of the NCL input, so no relayouts.
    xs = [x_ref[n] for n in range(N)]                      # (Cin, L) f32

    # ---- conv1 (1x1) -> bn1 -> relu (conv bias cancels under training BN) ----
    y1 = [mm(w1_ref[...], xn) for xn in xs]
    a1, b1 = bn_coeffs(y1, g1_ref[...], t1_ref[...])
    y1 = [jnp.maximum(y * a1 + b1, 0.0) for y in y1]

    # ---- conv2 (k=3, pad=1, stride=1): three accumulated matmuls ----
    y2 = []
    for y in y1:
        yp, yc, yn = taps(y)
        y2.append(mm(w2_ref[0], yp) + mm(w2_ref[1], yc) + mm(w2_ref[2], yn))
    a2, b2 = bn_coeffs(y2, g2_ref[...], t2_ref[...])
    y2 = [jnp.maximum(y * a2 + b2, 0.0) for y in y2]

    # ---- conv3 (1x1) -> bn3 ----
    y3 = [mm(w3_ref[...], y) for y in y2]
    a3, b3 = bn_coeffs(y3, g3_ref[...], t3_ref[...])

    # ---- residual projection (conv4) + add + relu; store directly in NCL ----
    for n in range(N):
        res = mm(w4_ref[...], xs[n]) + b4_ref[...]
        out_ref[n] = jnp.maximum(y3[n] * a3 + b3 + res, 0.0).astype(out_ref.dtype)


def residual1d2_pallas(x, p):
    """x: (N, Cin, L) float32 (PyTorch NCL). Returns (N, Cout, L). strides=1."""
    N, Cin, L = x.shape
    Cmid = p["w1"].shape[0]
    Cout = p["w3"].shape[0]
    f32 = jnp.float32

    col = lambda v: v.reshape(-1, 1).astype(f32)           # per-channel params as (C, 1)

    # torch Conv1d weight (Cout, Cin, K) -> (Cout, Cin) mats (taps stacked for k=3)
    w1 = p["w1"][:, :, 0].astype(f32)                      # (Cmid, Cin)
    w2 = jnp.transpose(p["w2"], (2, 0, 1)).astype(f32)     # (3, Cmid, Cmid)
    w3 = p["w3"][:, :, 0].astype(f32)                      # (Cout, Cmid)
    if p.get("w4") is not None:
        w4 = p["w4"][:, :, 0].astype(f32)                  # (Cout, Cin)
        b4 = col(p["b4"])
    else:  # use_1x1conv=False: identity residual (requires Cin == Cout)
        assert Cin == Cout, "identity residual needs matching channel counts"
        w4 = jnp.eye(Cout, dtype=f32)
        b4 = jnp.zeros((Cout, 1), f32)

    # NOTE: conv biases b1/b2/b3 are intentionally NOT passed — a bias added
    # immediately before a training-mode BatchNorm cancels in the mean-subtraction.
    args = (x, w1, w2, w3, w4, b4,
            col(p["g1"]), col(p["t1"]), col(p["g2"]), col(p["t2"]),
            col(p["g3"]), col(p["t3"]))

    flops = 2 * N * L * (Cin * Cmid + 3 * Cmid * Cmid + Cmid * Cout + Cin * Cout)
    bytes_accessed = 4 * (x.size + N * Cout * L
                          + int(w1.size) + int(w2.size) + int(w3.size) + int(w4.size))
    cost = pl.CostEstimate(flops=flops, transcendentals=2 * Cmid + Cout,
                           bytes_accessed=bytes_accessed)

    vmem = lambda: pl.BlockSpec(memory_space=pltpu.MemorySpace.VMEM)
    # Grid-free call: the whole (tiny) problem lives once in VMEM; see TODO above
    # for the row-tiled / two-pass-BN grid used at large N*L (and for v7x 2-TC).
    return pl.pallas_call(
        _residual1d2_kernel,
        out_shape=jax.ShapeDtypeStruct((N, Cout, L), f32),
        in_specs=[vmem() for _ in args],
        out_specs=vmem(),
        cost_estimate=cost,
        compiler_params=pltpu.CompilerParams(vmem_limit_bytes=32 * 1024 * 1024),
    )(*args)


# ---------------- pure-JAX reference (mirrors the PyTorch forward) ----------------
def residual1d2_ref(x, p):
    def conv1d(x, w, b, stride=1, pad=0):
        out = lax.conv_general_dilated(x, w, (stride,), [(pad, pad)],
                                       dimension_numbers=("NCH", "OIH", "NCH"),
                                       precision=lax.Precision.HIGHEST)
        return out + b[None, :, None]

    def bn(x, g, t):  # BatchNorm1d, training mode (biased batch statistics)
        mu = jnp.mean(x, axis=(0, 2), keepdims=True)
        var = jnp.mean((x - mu) ** 2, axis=(0, 2), keepdims=True)
        return (x - mu) / jnp.sqrt(var + EPS) * g[None, :, None] + t[None, :, None]

    y = jax.nn.relu(bn(conv1d(x, p["w1"], p["b1"]), p["g1"], p["t1"]))
    y = jax.nn.relu(bn(conv1d(y, p["w2"], p["b2"], 1, 1), p["g2"], p["t2"]))
    y = bn(conv1d(y, p["w3"], p["b3"]), p["g3"], p["t3"])
    res = conv1d(x, p["w4"], p["b4"]) if p.get("w4") is not None else x
    return jax.nn.relu(y + res)


if __name__ == "__main__":
    # Residual1d2(input_channels=4, inter_channels=8, num_channels=8,
    #             use_1x1conv=True, strides=1, kernel_size=3)
    N, Cin, Cmid, Cout, L = 2, 4, 8, 8, 16
    key = jax.random.PRNGKey(0)
    ks = jax.random.split(key, 16)
    p = {
        "w1": 0.50 * jax.random.normal(ks[0], (Cmid, Cin, 1), jnp.float32),
        "b1": 0.10 * jax.random.normal(ks[1], (Cmid,), jnp.float32),
        "w2": 0.25 * jax.random.normal(ks[2], (Cmid, Cmid, 3), jnp.float32),
        "b2": 0.10 * jax.random.normal(ks[3], (Cmid,), jnp.float32),
        "w3": 0.40 * jax.random.normal(ks[4], (Cout, Cmid, 1), jnp.float32),
        "b3": 0.10 * jax.random.normal(ks[5], (Cout,), jnp.float32),
        "w4": 0.50 * jax.random.normal(ks[6], (Cout, Cin, 1), jnp.float32),
        "b4": 0.10 * jax.random.normal(ks[7], (Cout,), jnp.float32),
        "g1": 1.0 + 0.1 * jax.random.normal(ks[8], (Cmid,), jnp.float32),
        "t1": 0.1 * jax.random.normal(ks[9], (Cmid,), jnp.float32),
        "g2": 1.0 + 0.1 * jax.random.normal(ks[10], (Cmid,), jnp.float32),
        "t2": 0.1 * jax.random.normal(ks[11], (Cmid,), jnp.float32),
        "g3": 1.0 + 0.1 * jax.random.normal(ks[12], (Cout,), jnp.float32),
        "t3": 0.1 * jax.random.normal(ks[13], (Cout,), jnp.float32),
    }
    x = jax.random.normal(ks[14], (N, Cin, L), jnp.float32)

    out = jax.block_until_ready(residual1d2_pallas(x, p))
    ref = jax.block_until_ready(residual1d2_ref(x, p))
    assert out.shape == (N, Cout, L), out.shape
    max_err = float(jnp.max(jnp.abs(out - ref)))
    # default-precision MXU vs HIGHEST-precision f32 reference
    assert jnp.allclose(out, ref, atol=5e-2, rtol=5e-2), max_err
    print("KERNEL_OK")
</pallas_src>

<mosaic_0001>
module attributes {stable_mosaic.version = 11 : i64} {
  func.func @_residual1d2_kernel(%arg0: memref<2x4x16xf32, #tpu.memory_space<vmem>>, %arg1: memref<8x4xf32, #tpu.memory_space<vmem>>, %arg2: memref<3x8x8xf32, #tpu.memory_space<vmem>>, %arg3: memref<8x8xf32, #tpu.memory_space<vmem>>, %arg4: memref<8x4xf32, #tpu.memory_space<vmem>>, %arg5: memref<8x1xf32, #tpu.memory_space<vmem>>, %arg6: memref<8x1xf32, #tpu.memory_space<vmem>>, %arg7: memref<8x1xf32, #tpu.memory_space<vmem>>, %arg8: memref<8x1xf32, #tpu.memory_space<vmem>>, %arg9: memref<8x1xf32, #tpu.memory_space<vmem>>, %arg10: memref<8x1xf32, #tpu.memory_space<vmem>>, %arg11: memref<8x1xf32, #tpu.memory_space<vmem>>, %arg12: memref<2x8x16xf32, #tpu.memory_space<vmem>>) attributes {dimension_semantics = [], scalar_prefetch = 0 : i64, scratch_operands = 0 : i64, tpu.core_type = #tpu.core_type<tc>} {
    %c0 = arith.constant 0 : index
    %c0_0 = arith.constant 0 : index
    %c0_1 = arith.constant 0 : index
    %0 = vector.load %arg0[%c0, %c0_0, %c0_1] : memref<2x4x16xf32, #tpu.memory_space<vmem>>, vector<1x4x16xf32>
    %1 = vector.shape_cast %0 : vector<1x4x16xf32> to vector<4x16xf32>
    %c1 = arith.constant 1 : index
    %c0_2 = arith.constant 0 : index
    %c0_3 = arith.constant 0 : index
    %2 = vector.load %arg0[%c1, %c0_2, %c0_3] : memref<2x4x16xf32, #tpu.memory_space<vmem>>, vector<1x4x16xf32>
    %3 = vector.shape_cast %2 : vector<1x4x16xf32> to vector<4x16xf32>
    %c0_4 = arith.constant 0 : index
    %c0_5 = arith.constant 0 : index
    %4 = vector.load %arg1[%c0_4, %c0_5] : memref<8x4xf32, #tpu.memory_space<vmem>>, vector<8x4xf32>
    %cst = arith.constant dense<0.000000e+00> : vector<8x16xf32>
    %5 = tpu.matmul %4, %1, %cst {dimension_numbers = #tpu.dot_dimension_numbers<[1], [0], [0], [1], [0, 0, 1, 1], [], []>} : vector<8x4xf32>, vector<4x16xf32>, vector<8x16xf32> -> vector<8x16xf32>
    %c0_6 = arith.constant 0 : index
    %c0_7 = arith.constant 0 : index
    %6 = vector.load %arg1[%c0_6, %c0_7] : memref<8x4xf32, #tpu.memory_space<vmem>>, vector<8x4xf32>
    %cst_8 = arith.constant dense<0.000000e+00> : vector<8x16xf32>
    %7 = tpu.matmul %6, %3, %cst_8 {dimension_numbers = #tpu.dot_dimension_numbers<[1], [0], [0], [1], [0, 0, 1, 1], [], []>} : vector<8x4xf32>, vector<4x16xf32>, vector<8x16xf32> -> vector<8x16xf32>
    %c0_9 = arith.constant 0 : index
    %c0_10 = arith.constant 0 : index
    %8 = vector.load %arg6[%c0_9, %c0_10] : memref<8x1xf32, #tpu.memory_space<vmem>>, vector<8x1xf32>
    %c0_11 = arith.constant 0 : index
    %c0_12 = arith.constant 0 : index
    %9 = vector.load %arg7[%c0_11, %c0_12] : memref<8x1xf32, #tpu.memory_space<vmem>>, vector<8x1xf32>
    %cst_13 = arith.constant dense<0.000000e+00> : vector<8xf32>
    %10 = vector.multi_reduction <add>, %5, %cst_13 [1] : vector<8x16xf32> to vector<8xf32>
    %11 = vector.shape_cast %10 : vector<8xf32> to vector<8x1xf32>
    %cst_14 = arith.constant 0.000000e+00 : f32
    %12 = vector.broadcast %cst_14 : f32 to vector<8x1xf32>
    %13 = arith.addf %12, %11 : vector<8x1xf32>
    %cst_15 = arith.constant dense<0.000000e+00> : vector<8xf32>
    %14 = vector.multi_reduction <add>, %7, %cst_15 [1] : vector<8x16xf32> to vector<8xf32>
    %15 = vector.shape_cast %14 : vector<8xf32> to vector<8x1xf32>
    %16 = arith.addf %13, %15 : vector<8x1xf32>
    %cst_16 = arith.constant 3.125000e-02 : f32
    %17 = vector.broadcast %cst_16 : f32 to vector<8x1xf32>
    %18 = arith.mulf %16, %17 : vector<8x1xf32>
    %19 = vector.broadcast %18 : vector<8x1xf32> to vector<8x16xf32>
    %20 = arith.subf %5, %19 : vector<8x16xf32>
    %21 = vector.broadcast %18 : vector<8x1xf32> to vector<8x16xf32>
    %22 = arith.subf %5, %21 : vector<8x16xf32>
    %23 = arith.mulf %20, %22 : vector<8x16xf32>
    %cst_17 = arith.constant dense<0.000000e+00> : vector<8xf32>
    %24 = vector.multi_reduction <add>, %23, %cst_17 [1] : vector<8x16xf32> to vector<8xf32>
    %25 = vector.shape_cast %24 : vector<8xf32> to vector<8x1xf32>
    %cst_18 = arith.constant 0.000000e+00 : f32
    %26 = vector.broadcast %cst_18 : f32 to vector<8x1xf32>
    %27 = arith.addf %26, %25 : vector<8x1xf32>
    %28 = vector.broadcast %18 : vector<8x1xf32> to vector<8x16xf32>
    %29 = arith.subf %7, %28 : vector<8x16xf32>
    %30 = vector.broadcast %18 : vector<8x1xf32> to vector<8x16xf32>
    %31 = arith.subf %7, %30 : vector<8x16xf32>
    %32 = arith.mulf %29, %31 : vector<8x16xf32>
    %cst_19 = arith.constant dense<0.000000e+00> : vector<8xf32>
    %33 = vector.multi_reduction <add>, %32, %cst_19 [1] : vector<8x16xf32> to vector<8xf32>
    %34 = vector.shape_cast %33 : vector<8xf32> to vector<8x1xf32>
    %35 = arith.addf %27, %34 : vector<8x1xf32>
    %cst_20 = arith.constant 3.125000e-02 : f32
    %36 = vector.broadcast %cst_20 : f32 to vector<8x1xf32>
    %37 = arith.mulf %35, %36 : vector<8x1xf32>
    %cst_21 = arith.constant 9.99999974E-6 : f32
    %38 = vector.broadcast %cst_21 : f32 to vector<8x1xf32>
    %39 = arith.addf %37, %38 : vector<8x1xf32>
    %40 = math.rsqrt %39 : vector<8x1xf32>
    %41 = arith.mulf %8, %40 : vector<8x1xf32>
    %42 = arith.mulf %18, %41 : vector<8x1xf32>
    %43 = arith.subf %9, %42 : vector<8x1xf32>
    %44 = vector.broadcast %41 : vector<8x1xf32> to vector<8x16xf32>
    %45 = arith.mulf %5, %44 : vector<8x16xf32>
    %46 = vector.broadcast %43 : vector<8x1xf32> to vector<8x16xf32>
    %47 = arith.addf %45, %46 : vector<8x16xf32>
    %cst_22 = arith.constant 0.000000e+00 : f32
    %48 = vector.broadcast %cst_22 : f32 to vector<8x16xf32>
    %49 = arith.maximumf %47, %48 : vector<8x16xf32>
    %50 = vector.broadcast %41 : vector<8x1xf32> to vector<8x16xf32>
    %51 = arith.mulf %7, %50 : vector<8x16xf32>
    %52 = vector.broadcast %43 : vector<8x1xf32> to vector<8x16xf32>
    %53 = arith.addf %51, %52 : vector<8x16xf32>
    %cst_23 = arith.constant 0.000000e+00 : f32
    %54 = vector.broadcast %cst_23 : f32 to vector<8x16xf32>
    %55 = arith.maximumf %53, %54 : vector<8x16xf32>
    %cst_24 = arith.constant 0.000000e+00 : f32
    %56 = vector.broadcast %cst_24 : f32 to vector<8x1xf32>
    %57 = tpu.concatenate %56, %49, %56 in 1 : vector<8x1xf32>, vector<8x16xf32>, vector<8x1xf32> -> vector<8x18xf32>
    %58 = vector.extract_strided_slice %57 {offsets = [0, 0], sizes = [8, 16], strides = [1, 1]} : vector<8x18xf32> to vector<8x16xf32>
    %59 = vector.extract_strided_slice %57 {offsets = [0, 2], sizes = [8, 16], strides = [1, 1]} : vector<8x18xf32> to vector<8x16xf32>
    %c0_25 = arith.constant 0 : index
    %c0_26 = arith.constant 0 : index
    %c0_27 = arith.constant 0 : index
    %60 = vector.load %arg2[%c0_25, %c0_26, %c0_27] : memref<3x8x8xf32, #tpu.memory_space<vmem>>, vector<1x8x8xf32>
    %61 = vector.shape_cast %60 : vector<1x8x8xf32> to vector<8x8xf32>
    %cst_28 = arith.constant dense<0.000000e+00> : vector<8x16xf32>
    %62 = tpu.matmul %61, %58, %cst_28 {dimension_numbers = #tpu.dot_dimension_numbers<[1], [0], [0], [1], [0, 0, 1, 1], [], []>} : vector<8x8xf32>, vector<8x16xf32>, vector<8x16xf32> -> vector<8x16xf32>
    %c1_29 = arith.constant 1 : index
    %c0_30 = arith.constant 0 : index
    %c0_31 = arith.constant 0 : index
    %63 = vector.load %arg2[%c1_29, %c0_30, %c0_31] : memref<3x8x8xf32, #tpu.memory_space<vmem>>, vector<1x8x8xf32>
    %64 = vector.shape_cast %63 : vector<1x8x8xf32> to vector<8x8xf32>
    %cst_32 = arith.constant dense<0.000000e+00> : vector<8x16xf32>
    %65 = tpu.matmul %64, %49, %cst_32 {dimension_numbers = #tpu.dot_dimension_numbers<[1], [0], [0], [1], [0, 0, 1, 1], [], []>} : vector<8x8xf32>, vector<8x16xf32>, vector<8x16xf32> -> vector<8x16xf32>
    %66 = arith.addf %62, %65 : vector<8x16xf32>
    %c2 = arith.constant 2 : index
    %c0_33 = arith.constant 0 : index
    %c0_34 = arith.constant 0 : index
    %67 = vector.load %arg2[%c2, %c0_33, %c0_34] : memref<3x8x8xf32, #tpu.memory_space<vmem>>, vector<1x8x8xf32>
    %68 = vector.shape_cast %67 : vector<1x8x8xf32> to vector<8x8xf32>
    %cst_35 = arith.constant dense<0.000000e+00> : vector<8x16xf32>
    %69 = tpu.matmul %68, %59, %cst_35 {dimension_numbers = #tpu.dot_dimension_numbers<[1], [0], [0], [1], [0, 0, 1, 1], [], []>} : vector<8x8xf32>, vector<8x16xf32>, vector<8x16xf32> -> vector<8x16xf32>
    %70 = arith.addf %66, %69 : vector<8x16xf32>
    %cst_36 = arith.constant 0.000000e+00 : f32
    %71 = vector.broadcast %cst_36 : f32 to vector<8x1xf32>
    %72 = tpu.concatenate %71, %55, %71 in 1 : vector<8x1xf32>, vector<8x16xf32>, vector<8x1xf32> -> vector<8x18xf32>
    %73 = vector.extract_strided_slice %72 {offsets = [0, 0], sizes = [8, 16], strides = [1, 1]} : vector<8x18xf32> to vector<8x16xf32>
    %74 = vector.extract_strided_slice %72 {offsets = [0, 2], sizes = [8, 16], strides = [1, 1]} : vector<8x18xf32> to vector<8x16xf32>
    %c0_37 = arith.constant 0 : index
    %c0_38 = arith.constant 0 : index
    %c0_39 = arith.constant 0 : index
    %75 = vector.load %arg2[%c0_37, %c0_38, %c0_39] : memref<3x8x8xf32, #tpu.memory_space<vmem>>, vector<1x8x8xf32>
    %76 = vector.shape_cast %75 : vector<1x8x8xf32> to vector<8x8xf32>
    %cst_40 = arith.constant dense<0.000000e+00> : vector<8x16xf32>
    %77 = tpu.matmul %76, %73, %cst_40 {dimension_numbers = #tpu.dot_dimension_numbers<[1], [0], [0], [1], [0, 0, 1, 1], [], []>} : vector<8x8xf32>, vector<8x16xf32>, vector<8x16xf32> -> vector<8x16xf32>
    %c1_41 = arith.constant 1 : index
    %c0_42 = arith.constant 0 : index
    %c0_43 = arith.constant 0 : index
    %78 = vector.load %arg2[%c1_41, %c0_42, %c0_43] : memref<3x8x8xf32, #tpu.memory_space<vmem>>, vector<1x8x8xf32>
    %79 = vector.shape_cast %78 : vector<1x8x8xf32> to vector<8x8xf32>
    %cst_44 = arith.constant dense<0.000000e+00> : vector<8x16xf32>
    %80 = tpu.matmul %79, %55, %cst_44 {dimension_numbers = #tpu.dot_dimension_numbers<[1], [0], [0], [1], [0, 0, 1, 1], [], []>} : vector<8x8xf32>, vector<8x16xf32>, vector<8x16xf32> -> vector<8x16xf32>
    %81 = arith.addf %77, %80 : vector<8x16xf32>
    %c2_45 = arith.constant 2 : index
    %c0_46 = arith.constant 0 : index
    %c0_47 = arith.constant 0 : index
    %82 = vector.load %arg2[%c2_45, %c0_46, %c0_47] : memref<3x8x8xf32, #tpu.memory_space<vmem>>, vector<1x8x8xf32>
    %83 = vector.shape_cast %82 : vector<1x8x8xf32> to vector<8x8xf32>
    %cst_48 = arith.constant dense<0.000000e+00> : vector<8x16xf32>
    %84 = tpu.matmul %83, %74, %cst_48 {dimension_numbers = #tpu.dot_dimension_numbers<[1], [0], [0], [1], [0, 0, 1, 1], [], []>} : vector<8x8xf32>, vector<8x16xf32>, vector<8x16xf32> -> vector<8x16xf32>
    %85 = arith.addf %81, %84 : vector<8x16xf32>
    %c0_49 = arith.constant 0 : index
    %c0_50 = arith.constant 0 : index
    %86 = vector.load %arg8[%c0_49, %c0_50] : memref<8x1xf32, #tpu.memory_space<vmem>>, vector<8x1xf32>
    %c0_51 = arith.constant 0 : index
    %c0_52 = arith.constant 0 : index
    %87 = vector.load %arg9[%c0_51, %c0_52] : memref<8x1xf32, #tpu.memory_space<vmem>>, vector<8x1xf32>
    %cst_53 = arith.constant dense<0.000000e+00> : vector<8xf32>
    %88 = vector.multi_reduction <add>, %70, %cst_53 [1] : vector<8x16xf32> to vector<8xf32>
    %89 = vector.shape_cast %88 : vector<8xf32> to vector<8x1xf32>
    %cst_54 = arith.constant 0.000000e+00 : f32
    %90 = vector.broadcast %cst_54 : f32 to vector<8x1xf32>
    %91 = arith.addf %90, %89 : vector<8x1xf32>
    %cst_55 = arith.constant dense<0.000000e+00> : vector<8xf32>
    %92 = vector.multi_reduction <add>, %85, %cst_55 [1] : vector<8x16xf32> to vector<8xf32>
    %93 = vector.shape_cast %92 : vector<8xf32> to vector<8x1xf32>
    %94 = arith.addf %91, %93 : vector<8x1xf32>
    %cst_56 = arith.constant 3.125000e-02 : f32
    %95 = vector.broadcast %cst_56 : f32 to vector<8x1xf32>
    %96 = arith.mulf %94, %95 : vector<8x1xf32>
    %97 = vector.broadcast %96 : vector<8x1xf32> to vector<8x16xf32>
    %98 = arith.subf %70, %97 : vector<8x16xf32>
    %99 = vector.broadcast %96 : vector<8x1xf32> to vector<8x16xf32>
    %100 = arith.subf %70, %99 : vector<8x16xf32>
    %101 = arith.mulf %98, %100 : vector<8x16xf32>
    %cst_57 = arith.constant dense<0.000000e+00> : vector<8xf32>
    %102 = vector.multi_reduction <add>, %101, %cst_57 [1] : vector<8x16xf32> to vector<8xf32>
    %103 = vector.shape_cast %102 : vector<8xf32> to vector<8x1xf32>
    %cst_58 = arith.constant 0.000000e+00 : f32
    %104 = vector.broadcast %cst_58 : f32 to vector<8x1xf32>
    %105 = arith.addf %104, %103 : vector<8x1xf32>
    %106 = vector.broadcast %96 : vector<8x1xf32> to vector<8x16xf32>
    %107 = arith.subf %85, %106 : vector<8x16xf32>
    %108 = vector.broadcast %96 : vector<8x1xf32> to vector<8x16xf32>
    %109 = arith.subf %85, %108 : vector<8x16xf32>
    %110 = arith.mulf %107, %109 : vector<8x16xf32>
    %cst_59 = arith.constant dense<0.000000e+00> : vector<8xf32>
    %111 = vector.multi_reduction <add>, %110, %cst_59 [1] : vector<8x16xf32> to vector<8xf32>
    %112 = vector.shape_cast %111 : vector<8xf32> to vector<8x1xf32>
    %113 = arith.addf %105, %112 : vector<8x1xf32>
    %cst_60 = arith.constant 3.125000e-02 : f32
    %114 = vector.broadcast %cst_60 : f32 to vector<8x1xf32>
    %115 = arith.mulf %113, %114 : vector<8x1xf32>
    %cst_61 = arith.constant 9.99999974E-6 : f32
    %116 = vector.broadcast %cst_61 : f32 to vector<8x1xf32>
    %117 = arith.addf %115, %116 : vector<8x1xf32>
    %118 = math.rsqrt %117 : vector<8x1xf32>
    %119 = arith.mulf %86, %118 : vector<8x1xf32>
    %120 = arith.mulf %96, %119 : vector<8x1xf32>
    %121 = arith.subf %87, %120 : vector<8x1xf32>
    %122 = vector.broadcast %119 : vector<8x1xf32> to vector<8x16xf32>
    %123 = arith.mulf %70, %122 : vector<8x16xf32>
    %124 = vector.broadcast %121 : vector<8x1xf32> to vector<8x16xf32>
    %125 = arith.addf %123, %124 : vector<8x16xf32>
    %cst_62 = arith.constant 0.000000e+00 : f32
    %126 = vector.broadcast %cst_62 : f32 to vector<8x16xf32>
    %127 = arith.maximumf %125, %126 : vector<8x16xf32>
    %128 = vector.broadcast %119 : vector<8x1xf32> to vector<8x16xf32>
    %129 = arith.mulf %85, %128 : vector<8x16xf32>
    %130 = vector.broadcast %121 : vector<8x1xf32> to vector<8x16xf32>
    %131 = arith.addf %129, %130 : vector<8x16xf32>
    %cst_63 = arith.constant 0.000000e+00 : f32
    %132 = vector.broadcast %cst_63 : f32 to vector<8x16xf32>
    %133 = arith.maximumf %131, %132 : vector<8x16xf32>
    %c0_64 = arith.constant 0 : index
    %c0_65 = arith.constant 0 : index
    %134 = vector.load %arg3[%c0_64, %c0_65] : memref<8x8xf32, #tpu.memory_space<vmem>>, vector<8x8xf32>
    %cst_66 = arith.constant dense<0.000000e+00> : vector<8x16xf32>
    %135 = tpu.matmul %134, %127, %cst_66 {dimension_numbers = #tpu.dot_dimension_numbers<[1], [0], [0], [1], [0, 0, 1, 1], [], []>} : vector<8x8xf32>, vector<8x16xf32>, vector<8x16xf32> -> vector<8x16xf32>
    %c0_67 = arith.constant 0 : index
    %c0_68 = arith.constant 0 : index
    %136 = vector.load %arg3[%c0_67, %c0_68] : memref<8x8xf32, #tpu.memory_space<vmem>>, vector<8x8xf32>
    %cst_69 = arith.constant dense<0.000000e+00> : vector<8x16xf32>
    %137 = tpu.matmul %136, %133, %cst_69 {dimension_numbers = #tpu.dot_dimension_numbers<[1], [0], [0], [1], [0, 0, 1, 1], [], []>} : vector<8x8xf32>, vector<8x16xf32>, vector<8x16xf32> -> vector<8x16xf32>
    %c0_70 = arith.constant 0 : index
    %c0_71 = arith.constant 0 : index
    %138 = vector.load %arg10[%c0_70, %c0_71] : memref<8x1xf32, #tpu.memory_space<vmem>>, vector<8x1xf32>
    %c0_72 = arith.constant 0 : index
    %c0_73 = arith.constant 0 : index
    %139 = vector.load %arg11[%c0_72, %c0_73] : memref<8x1xf32, #tpu.memory_space<vmem>>, vector<8x1xf32>
    %cst_74 = arith.constant dense<0.000000e+00> : vector<8xf32>
    %140 = vector.multi_reduction <add>, %135, %cst_74 [1] : vector<8x16xf32> to vector<8xf32>
    %141 = vector.shape_cast %140 : vector<8xf32> to vector<8x1xf32>
    %cst_75 = arith.constant 0.000000e+00 : f32
    %142 = vector.broadcast %cst_75 : f32 to vector<8x1xf32>
    %143 = arith.addf %142, %141 : vector<8x1xf32>
    %cst_76 = arith.constant dense<0.000000e+00> : vector<8xf32>
    %144 = vector.multi_reduction <add>, %137, %cst_76 [1] : vector<8x16xf32> to vector<8xf32>
    %145 = vector.shape_cast %144 : vector<8xf32> to vector<8x1xf32>
    %146 = arith.addf %143, %145 : vector<8x1xf32>
    %cst_77 = arith.constant 3.125000e-02 : f32
    %147 = vector.broadcast %cst_77 : f32 to vector<8x1xf32>
    %148 = arith.mulf %146, %147 : vector<8x1xf32>
    %149 = vector.broadcast %148 : vector<8x1xf32> to vector<8x16xf32>
    %150 = arith.subf %135, %149 : vector<8x16xf32>
    %151 = vector.broadcast %148 : vector<8x1xf32> to vector<8x16xf32>
    %152 = arith.subf %135, %151 : vector<8x16xf32>
    %153 = arith.mulf %150, %152 : vector<8x16xf32>
    %cst_78 = arith.constant dense<0.000000e+00> : vector<8xf32>
    %154 = vector.multi_reduction <add>, %153, %cst_78 [1] : vector<8x16xf32> to vector<8xf32>
    %155 = vector.shape_cast %154 : vector<8xf32> to vector<8x1xf32>
    %cst_79 = arith.constant 0.000000e+00 : f32
    %156 = vector.broadcast %cst_79 : f32 to vector<8x1xf32>
    %157 = arith.addf %156, %155 : vector<8x1xf32>
    %158 = vector.broadcast %148 : vector<8x1xf32> to vector<8x16xf32>
    %159 = arith.subf %137, %158 : vector<8x16xf32>
    %160 = vector.broadcast %148 : vector<8x1xf32> to vector<8x16xf32>
    %161 = arith.subf %137, %160 : vector<8x16xf32>
    %162 = arith.mulf %159, %161 : vector<8x16xf32>
    %cst_80 = arith.constant dense<0.000000e+00> : vector<8xf32>
    %163 = vector.multi_reduction <add>, %162, %cst_80 [1] : vector<8x16xf32> to vector<8xf32>
    %164 = vector.shape_cast %163 : vector<8xf32> to vector<8x1xf32>
    %165 = arith.addf %157, %164 : vector<8x1xf32>
    %cst_81 = arith.constant 3.125000e-02 : f32
    %166 = vector.broadcast %cst_81 : f32 to vector<8x1xf32>
    %167 = arith.mulf %165, %166 : vector<8x1xf32>
    %cst_82 = arith.constant 9.99999974E-6 : f32
    %168 = vector.broadcast %cst_82 : f32 to vector<8x1xf32>
    %169 = arith.addf %167, %168 : vector<8x1xf32>
    %170 = math.rsqrt %169 : vector<8x1xf32>
    %171 = arith.mulf %138, %170 : vector<8x1xf32>
    %172 = arith.mulf %148, %171 : vector<8x1xf32>
    %173 = arith.subf %139, %172 : vector<8x1xf32>
    %c0_83 = arith.constant 0 : index
    %c0_84 = arith.constant 0 : index
    %174 = vector.load %arg4[%c0_83, %c0_84] : memref<8x4xf32, #tpu.memory_space<vmem>>, vector<8x4xf32>
    %cst_85 = arith.constant dense<0.000000e+00> : vector<8x16xf32>
    %175 = tpu.matmul %174, %1, %cst_85 {dimension_numbers = #tpu.dot_dimension_numbers<[1], [0], [0], [1], [0, 0, 1, 1], [], []>} : vector<8x4xf32>, vector<4x16xf32>, vector<8x16xf32> -> vector<8x16xf32>
    %c0_86 = arith.constant 0 : index
    %c0_87 = arith.constant 0 : index
    %176 = vector.load %arg5[%c0_86, %c0_87] : memref<8x1xf32, #tpu.memory_space<vmem>>, vector<8x1xf32>
    %177 = vector.broadcast %176 : vector<8x1xf32> to vector<8x16xf32>
    %178 = arith.addf %175, %177 : vector<8x16xf32>
    %179 = vector.broadcast %171 : vector<8x1xf32> to vector<8x16xf32>
    %180 = arith.mulf %135, %179 : vector<8x16xf32>
    %181 = vector.broadcast %173 : vector<8x1xf32> to vector<8x16xf32>
    %182 = arith.addf %180, %181 : vector<8x16xf32>
    %183 = arith.addf %182, %178 : vector<8x16xf32>
    %cst_88 = arith.constant 0.000000e+00 : f32
    %184 = vector.broadcast %cst_88 : f32 to vector<8x16xf32>
    %185 = arith.maximumf %183, %184 : vector<8x16xf32>
    %c0_89 = arith.constant 0 : index
    %c0_90 = arith.constant 0 : index
    %c0_91 = arith.constant 0 : index
    %186 = vector.load %arg12[%c0_89, %c0_90, %c0_91] : memref<2x8x16xf32, #tpu.memory_space<vmem>>, vector<1x8x16xf32>
    %187 = vector.shape_cast %186 : vector<1x8x16xf32> to vector<8x16xf32>
    %188 = vector.shape_cast %185 : vector<8x16xf32> to vector<1x8x16xf32>
    tpu.vector_store %arg12[%c0_89, %c0_90, %c0_91], %188 {strides = array<i32>} : memref<2x8x16xf32, #tpu.memory_space<vmem>>, vector<1x8x16xf32>,
    %c0_92 = arith.constant 0 : index
    %c0_93 = arith.constant 0 : index
    %189 = vector.load %arg4[%c0_92, %c0_93] : memref<8x4xf32, #tpu.memory_space<vmem>>, vector<8x4xf32>
    %cst_94 = arith.constant dense<0.000000e+00> : vector<8x16xf32>
    %190 = tpu.matmul %189, %3, %cst_94 {dimension_numbers = #tpu.dot_dimension_numbers<[1], [0], [0], [1], [0, 0, 1, 1], [], []>} : vector<8x4xf32>, vector<4x16xf32>, vector<8x16xf32> -> vector<8x16xf32>
    %c0_95 = arith.constant 0 : index
    %c0_96 = arith.constant 0 : index
    %191 = vector.load %arg5[%c0_95, %c0_96] : memref<8x1xf32, #tpu.memory_space<vmem>>, vector<8x1xf32>
    %192 = vector.broadcast %191 : vector<8x1xf32> to vector<8x16xf32>
    %193 = arith.addf %190, %192 : vector<8x16xf32>
    %194 = vector.broadcast %171 : vector<8x1xf32> to vector<8x16xf32>
    %195 = arith.mulf %137, %194 : vector<8x16xf32>
    %196 = vector.broadcast %173 : vector<8x1xf32> to vector<8x16xf32>
    %197 = arith.addf %195, %196 : vector<8x16xf32>
    %198 = arith.addf %197, %193 : vector<8x16xf32>
    %cst_97 = arith.constant 0.000000e+00 : f32
    %199 = vector.broadcast %cst_97 : f32 to vector<8x16xf32>
    %200 = arith.maximumf %198, %199 : vector<8x16xf32>
    %c1_98 = arith.constant 1 : index
    %c0_99 = arith.constant 0 : index
    %c0_100 = arith.constant 0 : index
    %201 = vector.load %arg12[%c1_98, %c0_99, %c0_100] : memref<2x8x16xf32, #tpu.memory_space<vmem>>, vector<1x8x16xf32>
    %202 = vector.shape_cast %201 : vector<1x8x16xf32> to vector<8x16xf32>
    %203 = vector.shape_cast %200 : vector<8x16xf32> to vector<1x8x16xf32>
    tpu.vector_store %arg12[%c1_98, %c0_99, %c0_100], %203 {strides = array<i32>} : memref<2x8x16xf32, #tpu.memory_space<vmem>>, vector<1x8x16xf32>,
    return
  }
}

</mosaic_0001>

<bundles_post_ra>
// kernel: tpu_custom_call.1
= control target key start
LH: loop header
LB: loop body
LE: loop exit
PB: predicated region body
PF: predicated region fallthrough
CT: control target
= control target key end

     0   :  { %vm50_vm0 = vcmask 1043456   ;;  %vm46_vm1 = vcmask 31744   ;;  %s765_s0 = inlined_call_operand.vmem [shape: f32[2,4,16], index: 0, kind: input, shape index: {}]   ;;  %s766_s1 = inlined_call_operand.vmem [shape: f32[8,4], index: 1, kind: input, shape index: {}]   ;;  %s767_s2 = inlined_call_operand.vmem [shape: f32[3,8,8], index: 2, kind: input, shape index: {}]   ;;  %s768_s3 = inlined_call_operand.vmem [shape: f32[8,8], index: 3, kind: input, shape index: {}]   ;;  %s769_s4 = inlined_call_operand.vmem [shape: f32[8,4], index: 4, kind: input, shape index: {}]   ;;  %s770_s5 = inlined_call_operand.vmem [shape: f32[8,1], index: 5, kind: input, shape index: {}]   ;;  %s771_s6 = inlined_call_operand.vmem [shape: f32[8,1], index: 6, kind: input, shape index: {}]   ;;  %s772_s7 = inlined_call_operand.vmem [shape: f32[8,1], index: 7, kind: input, shape index: {}]   ;;  %s773_s8 = inlined_call_operand.vmem [shape: f32[8,1], index: 8, kind: input, shape index: {}]   ;;  %s774_s9 = inlined_call_operand.vmem [shape: f32[8,1], index: 9, kind: input, shape index: {}]   ;;  %s775_s10 = inlined_call_operand.vmem [shape: f32[8,1], index: 10, kind: input, shape index: {}]   ;;  %s776_s11 = inlined_call_operand.vmem [shape: f32[8,1], index: 11, kind: input, shape index: {}]   ;;  %s777_s12 = inlined_call_operand.hbm [shape: f32[2,8,16], index: 12, kind: output, shape index: {}]  }
   0x1   :  { %v682_v0 = vld [vmem:[%s765_s0] sm:$0xf]  ;;  %v692_v2 = vld [vmem:[%s765_s0 + $0x4] sm:$0xf] }
   0x2   :  { %v45_v1 = vld [vmem:[%s766_s1] sm:$0xff]  ;;  %547 = vmatpush.msk.msra.mxu0 %vm50_vm0, %v682_v0 }
   0x3   :  { %17 = vsyncpa [#allocation3], 0  ;;  %548 = vmatmul.msk.f32.vlgmr.msra.gmra.mxu0 %vm46_vm1, %v45_v1  ;;  %549 = vmatpush.msk.msra.mxu1 %vm50_vm0, %v692_v2  ;;  %vm99_vm2 = vcmask 130048   ;;  %v608_v17 = vmov 0   ;;  %v97_v28 = vld [vmem:[%s771_s6] sm:$0xff]  ;;  %s609_s6 = smov 1  }
   0x4   :  { %550 = vmatmul.msk.f32.vlgmr.msra.gmra.mxu1 %vm46_vm1, %v45_v1  ;;  %573 = vset.pattern.permute.xlu2 %v608_v17  ;;  %v98_v33 = vld [vmem:[%s772_s7] sm:$0xff]  ;;  %v551_v43 = vld [vmem:[%s767_s2 + $0x8] sm:$0xff]  ;;  %vm163_vm6 = vcmask 64512   ;;  %vm156_vm7 = vcmask 7168   ;;  %vm158_vm8 = vcmask 138240   ;;  %s610_s14 = smov 126  }
   0x5   :  { %574 = vset.pattern.permute.xlu0 %v608_v17  ;;  %575 = vset.pattern.permute.xlu1 %v608_v17  ;;  %v160_v45 = vld [vmem:[%s767_s2] sm:$0xff]  ;;  %v555_v51 = vld [vmem:[%s767_s2 + $0x10] sm:$0xff]  ;;  %s534_s0 = sshll.u32 %s777_s12, 4  ;;  %s612_s1 = smov 128   ;;  %s535_s0 = int_to_ptr.hbm [resolvable:$true] %s534_s0 }
   0x6   :  { %s613_s27 = smov 8  }
  0x80   :  { %v71_v3 = vpop.f32.mrf.mxu0 }
  0x81   :  { %v100_v4 = vsel %vm99_vm2, %v71_v3, 0.0  ;;  %v94_v5 = vpop.f32.mrf.mxu1 }
  0x82   :  { %101 = vadd.xlane.f32.xlu0 %v100_v4  ;;  %v104_v6 = vsel %vm99_vm2, %v94_v5, 0.0 }
  0x8a   :  { %105 = vadd.xlane.f32.xlu0 %v104_v6 }
  0xf5   :  { %v102_v7 = vpop.xlane.xlu0 %101 }
  0xfd   :  { %v106_v8 = vpop.xlane.xlu0 %105 }
  0xfe   :  { %v107_v9 = vadd.f32 %v106_v8, %v102_v7 }
 0x100   :  { %v108_v10 = vmul.f32 0.03125, %v107_v9 }
 0x102   :  { %v109_v11 = vsub.f32 %v71_v3, %v108_v10  ;;  %v115_v14 = vsub.f32 %v94_v5, %v108_v10 }
 0x104   :  { %v110_v12 = vmul.f32 %v109_v11, %v109_v11  ;;  %v116_v15 = vmul.f32 %v115_v14, %v115_v14 }
 0x106   :  { %v111_v13 = vsel %vm99_vm2, %v110_v12, 0.0  ;;  %v117_v16 = vsel %vm99_vm2, %v116_v15, 0.0  ;;  %v447_v12 = vld [vmem:[%s769_s4] sm:$0xff] }
 0x107   :  { %112 = vadd.xlane.f32.xlu1 %v111_v13 }
 0x10f   :  { %118 = vadd.xlane.f32.xlu1 %v117_v16 }
 0x17a   :  { %v113_v18 = vpop.xlane.xlu1 %112 }
 0x182   :  { %v119_v19 = vpop.xlane.xlu1 %118 }
 0x183   :  { %v120_v20 = vadd.f32 %v119_v19, %v113_v18 }
 0x185   :  { %v121_v21 = vmul.f32 0.03125, %v120_v20 }
 0x187   :  { %v122_v22 = vadd.f32 1e-05, %v121_v21 }
 0x189   :  { %576 = vrsqrt.f32 %v122_v22  ;;  %vm129_vm4 = vweird.f32 %v122_v22 }
 0x18f   :  { %v577_v23 = vpop.eup %576 }
 0x190   :  { %v124_v24 = vmul.f32 %v577_v23, %v122_v22  ;;  %vm130_vm3 = vweird.f32 %v577_v23 }
 0x191   :  { %vm131_vm5 = vmor %vm129_vm4, %vm130_vm3 }
 0x192   :  { %v125_v25 = vmul.f32 %v577_v23, %v124_v24 }
 0x194   :  { %v126_v26 = vmul.f32 0.5, %v125_v25 }
 0x196   :  { %v127_v27 = vsub.f32 1.5, %v126_v26 }
 0x198   :  { %v128_v29 = vmul.f32 %v577_v23, %v127_v27  ;;  %v312_v27 = vld [vmem:[%s774_s9] sm:$0xff] }
 0x19a   :  { %v132_v30 = vsel %vm131_vm5, %v577_v23, %v128_v29  ;;  %v311_v23 = vld [vmem:[%s773_s8] sm:$0xff] }
 0x19b   :  { %v133_v31 = vmul.f32 %v132_v30, %v97_v28  ;;  %v448_v30 = vld [vmem:[%s770_s5] sm:$0xff] }
 0x19d   :  { %138 = vperm.xlu2 %573, %v133_v31   ;;  %v134_v32 = vmul.f32 %v133_v31, %v108_v10 }
 0x19f   :  { %v135_v34 = vsub.f32 %v98_v33, %v134_v32 }
 0x1a5   :  { %144 = vperm.xlu2 %573, %v135_v34  }
 0x1f7   :  { %v139_v35 = vpop.permute.xlu2 %138 }
 0x1f8   :  { %v141_v36 = vmul.f32 %v139_v35, %v71_v3  ;;  %v149_v37 = vmul.f32 %v139_v35, %v94_v5 }
 0x1ff   :  { %v145_v38 = vpop.permute.xlu2 %144 }
 0x200   :  { %v147_v39 = vadd.f32 %v145_v38, %v141_v36  ;;  %v150_v40 = vadd.f32 %v149_v37, %v145_v38 }
 0x202   :  { %v148_v41 = vmax.f32 %v147_v39, 0.0  ;;  %v151_v42 = vmax.f32 %v150_v40, 0.0  ;;  %v365_v39 = vld [vmem:[%s768_s3] sm:$0xff] }
 0x204   :  { %153 = vrot.lane.b32.xlu1 %v148_v41, %s609_s6  ;;  %182 = vmatpush.msra.mxu2 %v148_v41 }
 0x205   :  { %241 = vrot.lane.b32.xlu0 %v151_v42, %s609_s6  ;;  %261 = vmatpush.msrb.mxu1 %v151_v42 }
 0x206   :  { %552 = vmatmul.msk.f32.vlgmr.msra.gmra.mxu2 %vm163_vm6, %v551_v43  ;;  %557 = vmatmul.msk.f32.vlgmr.msrb.gmra.mxu1 %vm163_vm6, %v551_v43 }
 0x276   :  { %v154_v44 = vpop.permute.xlu1 %153 }
 0x277   :  { %v242_v46 = vpop.permute.xlu0 %241  ;;  %v157_v47 = vsel %vm156_vm7, 0.0, %v154_v44 }
 0x278   :  { %v244_v48 = vsel %vm156_vm7, 0.0, %v242_v46  ;;  %553 = vmatpush.msk.msra.mxu3 %vm158_vm8, %v157_v47  ;;  %v159_v50 = vsel %vm158_vm8, %v157_v47, 0.0 }
 0x279   :  { %v245_v49 = vsel %vm158_vm8, %v244_v48, 0.0  ;;  %558 = vmatpush.msk.msrb.mxu2 %vm158_vm8, %v244_v48  ;;  %554 = vmatmul.msk.f32.vlgmr.msra.gmra.mxu3 %vm163_vm6, %v160_v45 }
 0x27a   :  { %287 = vrot.lane.b32.xlu2 %v245_v49, %s610_s14  ;;  %559 = vmatmul.msk.f32.vlgmr.msrb.gmra.mxu2 %vm163_vm6, %v160_v45 }
 0x27b   :  { %563 = vmatpush.msk.msra.mxu2 %vm50_vm0, %v682_v0 }
 0x282   :  { %213 = vrot.lane.b32.xlu2 %v159_v50, %s610_s14  ;;  %564 = vmatmul.msk.f32.vlgmr.msra.gmra.mxu2 %vm46_vm1, %v447_v12 }
 0x283   :  { %v263_v56 = vpop.f32.mrf.mxu1 }
 0x289   :  { %v184_v54 = vpop.f32.mrf.mxu2 }
 0x2d4   :  { %v288_v52 = vpop.permute.xlu2 %287 }
 0x2d5   :  { %305 = vmatpush.msrb.mxu3 %v288_v52 }
 0x2d6   :  { %560 = vmatmul.msk.f32.vlgmr.msrb.gmra.mxu3 %vm163_vm6, %v555_v51 }
 0x2d7   :  { %565 = vmatpush.msk.msra.mxu3 %vm50_vm0, %v692_v2 }
 0x2dc   :  { %v214_v53 = vpop.permute.xlu2 %213 }
 0x2dd   :  { %234 = vmatpush.msrb.mxu0 %v214_v53 }
 0x2de   :  { %556 = vmatmul.msk.f32.vlgmr.msrb.gmra.mxu0 %vm163_vm6, %v555_v51  ;;  %566 = vmatmul.msk.f32.vlgmr.msra.gmra.mxu3 %vm46_vm1, %v447_v12 }
 0x2fc   :  { %v207_v55 = vpop.f32.mrf.mxu3 }
 0x2fd   :  { %v283_v57 = vpop.f32.mrf.mxu2  ;;  %v208_v60 = vadd.f32 %v207_v55, %v184_v54 }
 0x2fe   :  { %v284_v58 = vadd.f32 %v283_v57, %v263_v56 }
 0x359   :  { %v307_v59 = vpop.f32.mrf.mxu3 }
 0x35a   :  { %v310_v61 = vadd.f32 %v307_v59, %v284_v58 }
 0x35b   :  { %v236_v62 = vpop.f32.mrf.mxu0 }
 0x35c   :  { %v239_v63 = vadd.f32 %v236_v62, %v208_v60  ;;  %v317_v0 = vsel %vm99_vm2, %v310_v61, 0.0 }
 0x35d   :  { %318 = vadd.xlane.f32.xlu0 %v317_v0  ;;  %v409_v0 = vld [vmem:[%s775_s10] sm:$0xff]  ;;  %s611_s10 = smov [#allocation2]  }
 0x35e   :  { %v313_v1 = vsel %vm99_vm2, %v239_v63, 0.0 }
 0x35f   :  { %314 = vadd.xlane.f32.xlu2 %v313_v1 }
 0x3d0   :  { %v319_v2 = vpop.xlane.xlu0 %318 }
 0x3d2   :  { %v315_v3 = vpop.xlane.xlu2 %314 }
 0x3d3   :  { %v320_v4 = vadd.f32 %v319_v2, %v315_v3 }
 0x3d5   :  { %v321_v5 = vmul.f32 0.03125, %v320_v4  ;;  %v410_v4 = vld [vmem:[%s776_s11] sm:$0xff]  ;;  %s532_s11 = sshll.u32 %s611_s10, 4  ;;  %s533_s11 = int_to_ptr.vmem [resolvable:$true] %s532_s11 }
 0x3d7   :  { %v328_v6 = vsub.f32 %v310_v61, %v321_v5  ;;  %v322_v7 = vsub.f32 %v239_v63, %v321_v5 }
 0x3d9   :  { %v329_v8 = vmul.f32 %v328_v6, %v328_v6  ;;  %v323_v9 = vmul.f32 %v322_v7, %v322_v7 }
 0x3db   :  { %v330_v10 = vsel %vm99_vm2, %v329_v8, 0.0  ;;  %v324_v11 = vsel %vm99_vm2, %v323_v9, 0.0  ;;  %v474_v9 = vpop.f32.mrf.mxu2 }
 0x3dc   :  { %331 = vadd.xlane.f32.xlu2 %v330_v10  ;;  %325 = vadd.xlane.f32.xlu1 %v324_v11 }
 0x44f   :  { %v332_v13 = vpop.xlane.xlu2 %331  ;;  %v326_v14 = vpop.xlane.xlu1 %325 }
 0x450   :  { %v333_v15 = vadd.f32 %v332_v13, %v326_v14  ;;  %v519_v14 = vpop.f32.mrf.mxu3 }
 0x452   :  { %v334_v16 = vmul.f32 0.03125, %v333_v15 }
 0x454   :  { %v335_v17 = vadd.f32 1e-05, %v334_v16 }
 0x456   :  { %578 = vrsqrt.f32 %v335_v17  ;;  %vm342_vm10 = vweird.f32 %v335_v17 }
 0x45c   :  { %v579_v18 = vpop.eup %578 }
 0x45d   :  { %v337_v19 = vmul.f32 %v579_v18, %v335_v17  ;;  %vm343_vm9 = vweird.f32 %v579_v18 }
 0x45e   :  { %vm344_vm11 = vmor %vm342_vm10, %vm343_vm9 }
 0x45f   :  { %v338_v20 = vmul.f32 %v579_v18, %v337_v19 }
 0x461   :  { %v339_v21 = vmul.f32 0.5, %v338_v20 }
 0x463   :  { %v340_v22 = vsub.f32 1.5, %v339_v21 }
 0x465   :  { %v341_v24 = vmul.f32 %v579_v18, %v340_v22 }
 0x467   :  { %v345_v25 = vsel %vm344_vm11, %v579_v18, %v341_v24 }
 0x468   :  { %v346_v26 = vmul.f32 %v345_v25, %v311_v23 }
 0x46a   :  { %351 = vperm.xlu0 %574, %v346_v26   ;;  %v347_v28 = vmul.f32 %v346_v26, %v321_v5 }
 0x46c   :  { %v348_v29 = vsub.f32 %v312_v27, %v347_v28 }
 0x46e   :  { %357 = vperm.xlu2 %573, %v348_v29  }
 0x472   :  { %451 = vperm.xlu0 %574, %v448_v30  }
 0x4c8   :  { %v358_v34 = vpop.permute.xlu2 %357 }
 0x4dc   :  { %v352_v31 = vpop.permute.xlu0 %351 }
 0x4dd   :  { %v354_v32 = vmul.f32 %v352_v31, %v239_v63  ;;  %v362_v33 = vmul.f32 %v352_v31, %v310_v61 }
 0x4df   :  { %v360_v35 = vadd.f32 %v358_v34, %v354_v32  ;;  %v363_v36 = vadd.f32 %v362_v33, %v358_v34 }
 0x4e1   :  { %v361_v37 = vmax.f32 %v360_v35, 0.0  ;;  %v364_v38 = vmax.f32 %v363_v36, 0.0 }
 0x4e3   :  { %384 = vmatpush.msra.mxu0 %v361_v37  ;;  %404 = vmatpush.msra.mxu1 %v364_v38 }
 0x4e4   :  { %561 = vmatmul.msk.f32.vlgmr.msra.gmra.mxu0 %vm163_vm6, %v365_v39  ;;  %562 = vmatmul.msk.f32.vlgmr.msra.gmra.mxu1 %vm163_vm6, %v365_v39  ;;  %v452_v7 = vpop.permute.xlu0 %451 }
 0x4e5   :  { %v475_v12 = vadd.f32 %v474_v9, %v452_v7 }
 0x561   :  { %v386_v40 = vpop.f32.mrf.mxu0  ;;  %v406_v42 = vpop.f32.mrf.mxu1 }
 0x562   :  { %v411_v41 = vsel %vm99_vm2, %v386_v40, 0.0  ;;  %v415_v43 = vsel %vm99_vm2, %v406_v42, 0.0 }
 0x563   :  { %412 = vadd.xlane.f32.xlu1 %v411_v41 }
 0x56b   :  { %416 = vadd.xlane.f32.xlu1 %v415_v43 }
 0x5d6   :  { %v413_v44 = vpop.xlane.xlu1 %412 }
 0x5de   :  { %v417_v45 = vpop.xlane.xlu1 %416 }
 0x5df   :  { %v418_v46 = vadd.f32 %v417_v45, %v413_v44 }
 0x5e1   :  { %v419_v47 = vmul.f32 0.03125, %v418_v46 }
 0x5e3   :  { %v426_v48 = vsub.f32 %v406_v42, %v419_v47  ;;  %v420_v49 = vsub.f32 %v386_v40, %v419_v47 }
 0x5e5   :  { %v427_v50 = vmul.f32 %v426_v48, %v426_v48  ;;  %v421_v51 = vmul.f32 %v420_v49, %v420_v49 }
 0x5e7   :  { %v428_v52 = vsel %vm99_vm2, %v427_v50, 0.0  ;;  %v422_v53 = vsel %vm99_vm2, %v421_v51, 0.0 }
 0x5e8   :  { %429 = vadd.xlane.f32.xlu2 %v428_v52  ;;  %423 = vadd.xlane.f32.xlu1 %v422_v53 }
 0x65b   :  { %v430_v54 = vpop.xlane.xlu2 %429  ;;  %v424_v55 = vpop.xlane.xlu1 %423 }
 0x65c   :  { %v431_v56 = vadd.f32 %v430_v54, %v424_v55 }
 0x65e   :  { %v432_v57 = vmul.f32 0.03125, %v431_v56 }
 0x660   :  { %v433_v58 = vadd.f32 1e-05, %v432_v57 }
 0x662   :  { %580 = vrsqrt.f32 %v433_v58  ;;  %vm440_vm13 = vweird.f32 %v433_v58 }
 0x668   :  { %v581_v59 = vpop.eup %580 }
 0x669   :  { %v435_v60 = vmul.f32 %v581_v59, %v433_v58  ;;  %vm441_vm12 = vweird.f32 %v581_v59 }
 0x66a   :  { %vm442_vm14 = vmor %vm440_vm13, %vm441_vm12 }
 0x66b   :  { %v436_v61 = vmul.f32 %v581_v59, %v435_v60 }
 0x66d   :  { %v437_v62 = vmul.f32 0.5, %v436_v61 }
 0x66f   :  { %v438_v63 = vsub.f32 1.5, %v437_v62 }
 0x671   :  { %v439_v1 = vmul.f32 %v581_v59, %v438_v63 }
 0x673   :  { %v443_v2 = vsel %vm442_vm14, %v581_v59, %v439_v1 }
 0x674   :  { %v444_v3 = vmul.f32 %v443_v2, %v409_v0 }
 0x676   :  { %479 = vperm.xlu1 %575, %v444_v3   ;;  %v445_v5 = vmul.f32 %v444_v3, %v419_v47 }
 0x678   :  { %v446_v6 = vsub.f32 %v410_v4, %v445_v5 }
 0x67a   :  { %485 = vperm.xlu0 %574, %v446_v6  }
 0x67e   :  { %496 = vperm.xlu1 %575, %v448_v30  }
 0x6e8   :  { %v480_v8 = vpop.permute.xlu1 %479 }
 0x6e9   :  { %v482_v10 = vmul.f32 %v480_v8, %v386_v40  ;;  %v522_v15 = vmul.f32 %v480_v8, %v406_v42 }
 0x6ec   :  { %v486_v11 = vpop.permute.xlu0 %485 }
 0x6ed   :  { %v488_v13 = vadd.f32 %v486_v11, %v482_v10  ;;  %v523_v19 = vadd.f32 %v522_v15, %v486_v11 }
 0x6ef   :  { %v489_v16 = vadd.f32 %v488_v13, %v475_v12 }
 0x6f0   :  { %v497_v17 = vpop.permute.xlu1 %496 }
 0x6f1   :  { %v490_v18 = vmax.f32 %v489_v16, 0.0  ;;  %v520_v20 = vadd.f32 %v519_v14, %v497_v17 }
 0x6f3   :  { %491 = vst.msk [vmem:[#allocation2] sm:$0xff] %vm99_vm2, %v490_v18  ;;  %v524_v21 = vadd.f32 %v523_v19, %v520_v20 }
 0x6f5   :  { %v525_v22 = vmax.f32 %v524_v21, 0.0 }
 0x6f7   :  { %527 = vst.msk [vmem:[#allocation2 + $0x8] sm:$0xff] %vm99_vm2, %v525_v22 }
 0x6f8   :  { %540 = dma.vmem_to_hbm [thread:$0]  %s533_s11, 256, %s535_s0, [#allocation3], %s612_s1, %s612_s1, %s613_s27  }
 0x6f9   :  { %606 = dma.done.wait [#allocation3], 256  }
 0x6fa   :  { %607 = vsyncadd [#allocation3], 4294967040 }
 0x6fb   :  { %545 = vsyncpa [#allocation3], 1 }

</bundles_post_ra>
